<compile_context>
chip_gen: v7x
topology: tpu7x:2x2x1
jax: 0.10.0
libtpu: 0.0.40
codegen_flags: <defaults>
</compile_context>

<pallas_src>
import functools

import jax
import jax.numpy as jnp
from jax.experimental import pallas as pl
from jax.experimental.pallas import tpu as pltpu


# Preferred tile sizes; actual tiles are clamped so they divide the padded
# problem dims (see _pick_tile).  Working set at the defaults is ~2.3 MiB
# (double-buffered x/w tiles + resident out tile): far under the scoped VMEM
# limit on v5e/v6e (32/128 MiB) and v7x (32/64 MiB).
_TM_PREF = 256   # batch tile    (multiple of 8)
_TN_PREF = 256   # class tile    (multiple of 128)
_TK_PREF = 512   # feature tile  (multiple of 128)


def _round_up(x, m):
    return (x + m - 1) // m * m


def _pick_tile(dim_padded, prefer, align):
    """Largest multiple of `align` that is <= `prefer` and divides `dim_padded`.

    `dim_padded` is already a multiple of `align`, so `align` always works as
    the final fallback.  This avoids over-padding the problem to tile
    multiples (e.g. C=300 no longer balloons to 512)."""
    if dim_padded <= prefer:
        return dim_padded
    t = (prefer // align) * align
    while t > align:
        if dim_padded % t == 0:
            return t
        t -= align
    return align


def _linear_single_kernel(x_ref, w_ref, b_ref, o_ref):
    # Whole problem in one tile: o = x @ W^T_padded + b, one unmasked store.
    o_ref[...] = (
        jnp.dot(x_ref[...], w_ref[...], preferred_element_type=jnp.float32)
        + b_ref[...]
    )


def _linear_tiled_kernel(x_ref, w_ref, b_ref, o_ref):
    # x_ref: (tm, tk)   activation tile
    # w_ref: (tk, tn)   weight tile, already transposed to (F, C) layout
    # b_ref: (1,  tn)   bias tile
    # o_ref: (tm, tn)   f32 output tile, resident across the K axis
    #
    # NOTE: correctness relies on K being the LAST (fastest-iterating) grid
    # axis so the (i, j) output tile stays resident while k sweeps.
    k = pl.program_id(2)

    @pl.when(k == 0)
    def _():
        # Seed the resident output tile with the bias (no separate f32
        # accumulator scratch, no last-k epilogue store).
        o_ref[...] = pl.broadcast_to(b_ref[...], o_ref.shape)

    o_ref[...] += jnp.dot(x_ref[...], w_ref[...],
                          preferred_element_type=jnp.float32)


@functools.partial(jax.jit, static_argnums=(3,))
def _policy_forward_padded(x, w_t_p, b_p, num_classes):
    """q = x @ W.T + b with pre-padded, pre-transposed parameters.

    x:      (B, F)    float32 activations (padded per call)
    w_t_p:  (Fp, Cp)  float32, weight.T zero-padded to (8,128)-aligned dims
    b_p:    (1, Cp)   float32, bias zero-padded
    """
    B, F = x.shape
    Fp, Cp = w_t_p.shape

    Bp = _round_up(B, 8)
    # Only the activations are padded per call; zero-padded features
    # contribute 0 to the contraction, padded classes are sliced off below.
    x_p = jnp.pad(x, ((0, Bp - B), (0, Fp - F)))

    if Bp <= _TM_PREF and Cp <= _TN_PREF and Fp <= _TK_PREF:
        # Fast path: the shipped policy head (e.g. 8x32 -> 10) fits a single
        # VMEM tile.  No K loop, no pl.when, no accumulator.
        out_p = pl.pallas_call(
            _linear_single_kernel,
            out_shape=jax.ShapeDtypeStruct((Bp, Cp), jnp.float32),
            grid=(1,),
            in_specs=[
                pl.BlockSpec((Bp, Fp), lambda i: (0, 0)),
                pl.BlockSpec((Fp, Cp), lambda i: (0, 0)),
                pl.BlockSpec((1, Cp), lambda i: (0, 0)),
            ],
            out_specs=pl.BlockSpec((Bp, Cp), lambda i: (0, 0)),
        )(x_p, w_t_p, b_p)
    else:
        tm = _pick_tile(Bp, _TM_PREF, 8)
        tn = _pick_tile(Cp, _TN_PREF, 128)
        tk = _pick_tile(Fp, _TK_PREF, 128)
        # K (reduction) must stay the last grid axis: the output BlockSpec
        # ignores k, keeping the (i, j) tile resident across the K sweep.
        grid = (Bp // tm, Cp // tn, Fp // tk)

        out_p = pl.pallas_call(
            _linear_tiled_kernel,
            out_shape=jax.ShapeDtypeStruct((Bp, Cp), jnp.float32),
            grid_spec=pltpu.PrefetchScalarGridSpec(
                num_scalar_prefetch=0,
                grid=grid,
                in_specs=[
                    pl.BlockSpec((tm, tk), lambda i, j, k: (i, k)),   # x
                    pl.BlockSpec((tk, tn), lambda i, j, k: (k, j)),   # W^T (F,C)
                    pl.BlockSpec((1, tn), lambda i, j, k: (0, j)),    # bias
                ],
                out_specs=pl.BlockSpec((tm, tn), lambda i, j, k: (i, j)),
            ),
            compiler_params=pltpu.CompilerParams(
                dimension_semantics=("parallel", "parallel", "arbitrary")),
        )(x_p, w_t_p, b_p)

    return out_p[:B, :num_classes]


def make_policy_forward(weight, bias):
    """One-time parameter prep -> forward(x) callable.

    weight: (num_classes, units_layer) float32  (PyTorch nn.Linear layout)
    bias:   (num_classes,) float32
    """
    C, F = weight.shape
    Cp = _round_up(C, 128)
    Fp = _round_up(F, 128)

    # One-time, outside the per-call hot path:
    #   * transpose the static weight to (F, C) so the kernel is a plain
    #     (tm,tk)@(tk,tn) MXU matmul (no per-tile transpose question), and
    #   * zero-pad weight/bias to lane-dense (8,128)-aligned shapes so no
    #     per-call HBM rewrite of the full weight is needed.
    w_t_p = jnp.pad(jnp.asarray(weight, jnp.float32).T,
                    ((0, Fp - F), (0, Cp - C)))
    b_p = jnp.pad(jnp.asarray(bias, jnp.float32),
                  ((0, Cp - C),)).reshape(1, Cp)
    w_t_p = jax.device_put(w_t_p)
    b_p = jax.device_put(b_p)

    def forward(x):
        return _policy_forward_padded(x, w_t_p, b_p, C)

    return forward


def init_policy_params(key, units_layer, num_classes):
    """Deterministic init matching nn.Linear shapes (uniform +/- 1/sqrt(fan_in))."""
    kw, kb = jax.random.split(key)
    bound = 1.0 / jnp.sqrt(jnp.float32(units_layer))
    weight = jax.random.uniform(kw, (num_classes, units_layer),
                                minval=-bound, maxval=bound, dtype=jnp.float32)
    bias = jax.random.uniform(kb, (num_classes,),
                              minval=-bound, maxval=bound, dtype=jnp.float32)
    return weight, bias


if __name__ == "__main__":
    # params = {'num_classes': 10, 'units_layer': 32,
    #           'model_specification': {'num_layers': ...}}  -> single Linear(32, 10)
    batch = 8
    units_layer = 32
    num_classes = 10

    key = jax.random.PRNGKey(0)
    kx, kp, kx2, kp2 = jax.random.split(key, 4)

    # --- shipped shape: exercises the single-tile fast path -----------------
    x = jax.random.normal(kx, (batch, units_layer), dtype=jnp.float32)
    weight, bias = init_policy_params(kp, units_layer, num_classes)

    forward = make_policy_forward(weight, bias)
    q_values = jax.block_until_ready(forward(x))

    ref = jnp.dot(x, weight.T, precision=jax.lax.Precision.HIGHEST) + bias
    assert q_values.shape == (batch, num_classes)
    assert jnp.allclose(q_values, ref, atol=1e-5, rtol=1e-5)

    # --- larger shape: exercises the 3-axis tiled path (K > 1, N > 1) -------
    B2, F2, C2 = 200, 1200, 300
    x2 = jax.random.normal(kx2, (B2, F2), dtype=jnp.float32)
    w2, b2 = init_policy_params(kp2, F2, C2)
    q2 = jax.block_until_ready(make_policy_forward(w2, b2)(x2))
    ref2 = jnp.dot(x2, w2.T, precision=jax.lax.Precision.HIGHEST) + b2
    assert q2.shape == (B2, C2)
    assert jnp.allclose(q2, ref2, atol=5e-3, rtol=5e-3)

    print("KERNEL_OK")
</pallas_src>

<mosaic_0001>
module attributes {stable_mosaic.version = 11 : i64} {
  func.func @_linear_single_kernel(%arg0: i32, %arg1: memref<8x128xf32, #tpu.memory_space<vmem>>, %arg2: memref<128x128xf32, #tpu.memory_space<vmem>>, %arg3: memref<1x128xf32, #tpu.memory_space<vmem>>, %arg4: memref<8x128xf32, #tpu.memory_space<vmem>>) attributes {dimension_semantics = [#tpu.dimension_semantics<arbitrary>], iteration_bounds = array<i64: 1>, scalar_prefetch = 0 : i64, scratch_operands = 0 : i64, tpu.core_type = #tpu.core_type<tc>, window_params = [{pipeline_mode = #tpu.pipeline_mode<synchronous>, transform_indices = @transform_0, window_bounds = array<i64: 8, 128>}, {pipeline_mode = #tpu.pipeline_mode<synchronous>, transform_indices = @transform_1, window_bounds = array<i64: 128, 128>}, {pipeline_mode = #tpu.pipeline_mode<synchronous>, transform_indices = @transform_2, window_bounds = array<i64: 1, 128>}, {pipeline_mode = #tpu.pipeline_mode<synchronous>, transform_indices = @transform_3, window_bounds = array<i64: 8, 128>}]} {
    %c0 = arith.constant 0 : index
    %c0_0 = arith.constant 0 : index
    %0 = vector.load %arg1[%c0, %c0_0] : memref<8x128xf32, #tpu.memory_space<vmem>>, vector<8x128xf32>
    %c0_1 = arith.constant 0 : index
    %c0_2 = arith.constant 0 : index
    %1 = vector.load %arg2[%c0_1, %c0_2] : memref<128x128xf32, #tpu.memory_space<vmem>>, vector<128x128xf32>
    %cst = arith.constant dense<0.000000e+00> : vector<8x128xf32>
    %2 = tpu.matmul %0, %1, %cst {dimension_numbers = #tpu.dot_dimension_numbers<[1], [0], [0], [1], [0, 0, 1, 1], [], []>} : vector<8x128xf32>, vector<128x128xf32>, vector<8x128xf32> -> vector<8x128xf32>
    %c0_3 = arith.constant 0 : index
    %c0_4 = arith.constant 0 : index
    %3 = vector.load %arg3[%c0_3, %c0_4] : memref<1x128xf32, #tpu.memory_space<vmem>>, vector<1x128xf32>
    %4 = vector.broadcast %3 : vector<1x128xf32> to vector<8x128xf32>
    %5 = arith.addf %2, %4 : vector<8x128xf32>
    %c0_5 = arith.constant 0 : index
    %c0_6 = arith.constant 0 : index
    %6 = vector.load %arg4[%c0_5, %c0_6] : memref<8x128xf32, #tpu.memory_space<vmem>>, vector<8x128xf32>
    tpu.vector_store %arg4[%c0_5, %c0_6], %5 {strides = array<i32>} : memref<8x128xf32, #tpu.memory_space<vmem>>, vector<8x128xf32>,
    return
  }
  func.func @transform_0(%arg0: i32) -> (i32, i32) {
    %c0_i32 = arith.constant 0 : i32
    %c0_i32_0 = arith.constant 0 : i32
    %c0_i32_1 = arith.constant 0 : i32
    return %c0_i32, %c0_i32_0 : i32, i32
  }
  func.func @transform_1(%arg0: i32) -> (i32, i32) {
    %c0_i32 = arith.constant 0 : i32
    %c0_i32_0 = arith.constant 0 : i32
    %c0_i32_1 = arith.constant 0 : i32
    return %c0_i32, %c0_i32_0 : i32, i32
  }
  func.func @transform_2(%arg0: i32) -> (i32, i32) {
    %c0_i32 = arith.constant 0 : i32
    %c0_i32_0 = arith.constant 0 : i32
    %c0_i32_1 = arith.constant 0 : i32
    return %c0_i32, %c0_i32_0 : i32, i32
  }
  func.func @transform_3(%arg0: i32) -> (i32, i32) {
    %c0_i32 = arith.constant 0 : i32
    %c0_i32_0 = arith.constant 0 : i32
    %c0_i32_1 = arith.constant 0 : i32
    return %c0_i32, %c0_i32_0 : i32, i32
  }
}

</mosaic_0001>

<bundles_post_ra>
// kernel: _policy_forward_padded.1
= control target key start
LH: loop header
LB: loop body
LE: loop exit
PB: predicated region body
PF: predicated region fallthrough
CT: control target
= control target key end

     0   :  { %8 = vsyncpa [#allocation3], 0  ;;  %s328_s0 = inlined_call_operand.vmem [shape: f32[8,128], index: 0, kind: input, shape index: {}]   ;;  %s329_s1 = inlined_call_operand.hbm [shape: f32[128,128], index: 1, kind: input, shape index: {}]   ;;  %s330_s2 = inlined_call_operand.vmem [shape: f32[1,128], index: 2, kind: input, shape index: {}]   ;;  %s331_s3 = inlined_call_operand.hbm [shape: f32[8,128], index: 3, kind: output, shape index: {}]  }
   0x1   :  { %9 = vsyncpa [#allocation4], 0  ;;  %s271_s12 = smov [#allocation2]   ;;  %s223_s16 = scalar_lea.hbm %s329_s1, 2048 }
   0x2   :  { %s17_s13 = sshll.u32 %s271_s12, 4  ;;  %p224_p0 = scmp.ne.s32.totalorder %s329_s1, %s223_s16  ;;  %s18_s13 = int_to_ptr.vmem [resolvable:$true] %s17_s13 }
   0x3   :  { %p227_p1 = scmp.lt.u32.totalorder %s223_s16, %s329_s1 }
   0x5   :  { %p229_p2 = pnand %p227_p1, %p224_p0 }
   0x7   :  { %232 = shalt.err (!%p229_p2)
}
   0x8   :  { %s233_s21 = scalar_lea.vmem %s18_s13, 2048  ;;  %p238_p4 = scmp.lt.s32.totalorder %s18_s13, %s18_s13 }
   0x9   :  { %p234_p3 = scmp.ne.s32.totalorder %s18_s13, %s233_s21  ;;  %p239_p5 = scmp.lt.s32.totalorder %s233_s21, %s233_s21 }
   0xb   :  { %p240_p6 = por %p239_p5, %p238_p4 }
   0xd   :  { %p241_p7 = pnand %p240_p6, %p234_p3 }
   0xf   :  { %244 = shalt.err (!%p241_p7)
}
  0x10   :  { %s272_s22 = smov 128   ;;  %s273_s23 = smov 8  }
  0x11   :  { %23 = dma.hbm_to_vmem [thread:$0]  %s329_s1, 2048, %s18_s13, [#allocation3], %s272_s22, %s272_s22, %s273_s23  }
  0x12   :  { %267 = dma.done.wait [#allocation3], 2048  }
  0x13   :  { %268 = vsyncadd [#allocation3], 4294965248  ;;  %v274_v0 = vmov 0.0|0.0   ;;  %vm275_vm0 = vmmov 0   ;;  %v276_v1 = vmov 0.0   ;;  %v30_v2 = vld [vmem:[#allocation2] sm:$0xff] }
  0x14   :  { %192 = vmatprep.subr.bf16.mxu0 %v274_v0  ;;  %189 = vmatprep.mubr.msk.f32.mxu0 %vm275_vm0, %v276_v1  ;;  %v31_v3 = vld [vmem:[#allocation2 + $0x8] sm:$0xff]  ;;  %v32_v4 = vld [vmem:[#allocation2 + $0x10] sm:$0xff]  ;;  %v33_v6 = vld [vmem:[#allocation2 + $0x18] sm:$0xff]  ;;  %s277_s29 = smov [#allocation5]  }
  0x15   :  { %v193_v5 = vpack.c.bf16 %v31_v3, %v30_v2  ;;  %v196_v7 = vpack.c.bf16 %v33_v6, %v32_v4  ;;  %v34_v8 = vld [vmem:[#allocation2 + $0x20] sm:$0xff]  ;;  %v35_v9 = vld [vmem:[#allocation2 + $0x28] sm:$0xff]  ;;  %v36_v11 = vld [vmem:[#allocation2 + $0x30] sm:$0xff]  ;;  %s130_s30 = sshll.u32 %s277_s29, 4  ;;  %s131_s30 = int_to_ptr.vmem [resolvable:$true] %s130_s30 }
  0x16   :  { %v199_v10 = vpack.c.bf16 %v35_v9, %v34_v8  ;;  %v37_v12 = vld [vmem:[#allocation2 + $0x38] sm:$0xff]  ;;  %v38_v14 = vld [vmem:[#allocation2 + $0x40] sm:$0xff]  ;;  %v39_v15 = vld [vmem:[#allocation2 + $0x48] sm:$0xff]  ;;  %s245_s4 = scalar_lea.vmem %s131_s30, 128  ;;  %p250_p9 = scmp.lt.s32.totalorder %s131_s30, %s131_s30 }
  0x17   :  { %194 = vmatpush3.bf16.msra.mxu0 %v193_v5  ;;  %v202_v13 = vpack.c.bf16 %v37_v12, %v36_v11  ;;  %v205_v16 = vpack.c.bf16 %v39_v15, %v38_v14  ;;  %v40_v17 = vld [vmem:[#allocation2 + $0x50] sm:$0xff]  ;;  %v41_v18 = vld [vmem:[#allocation2 + $0x58] sm:$0xff]  ;;  %v42_v20 = vld [vmem:[#allocation2 + $0x60] sm:$0xff]  ;;  %p246_p8 = scmp.ne.s32.totalorder %s131_s30, %s245_s4  ;;  %p251_p10 = scmp.lt.s32.totalorder %s245_s4, %s245_s4 }
  0x18   :  { %195 = vmatprep.subr.bf16.mxu0 %v274_v0  ;;  %v208_v19 = vpack.c.bf16 %v41_v18, %v40_v17  ;;  %v43_v21 = vld [vmem:[#allocation2 + $0x68] sm:$0xff]  ;;  %v44_v23 = vld [vmem:[#allocation2 + $0x70] sm:$0xff]  ;;  %v45_v24 = vld [vmem:[#allocation2 + $0x78] sm:$0xff] }
  0x19   :  { %v211_v22 = vpack.c.bf16 %v43_v21, %v42_v20  ;;  %v214_v25 = vpack.c.bf16 %v45_v24, %v44_v23  ;;  %v29_v26 = vld [vmem:[%s328_s0] sm:$0xff]  ;;  %p252_p11 = por %p251_p10, %p250_p9 }
  0x1a   :  { %v139_v27 = vld [vmem:[%s330_s2] ss:$0 sm:$0xff] }
  0x1b   :  { %197 = vmatpush3.bf16.msra.mxu0 %v196_v7  ;;  %p253_p12 = pnand %p252_p11, %p246_p8 }
  0x1c   :  { %198 = vmatprep.subr.bf16.mxu0 %v274_v0 }
  0x1f   :  { %200 = vmatpush3.bf16.msra.mxu0 %v199_v10 }
  0x20   :  { %201 = vmatprep.subr.bf16.mxu0 %v274_v0 }
  0x23   :  { %203 = vmatpush3.bf16.msra.mxu0 %v202_v13 }
  0x24   :  { %204 = vmatprep.subr.bf16.mxu0 %v274_v0 }
  0x27   :  { %206 = vmatpush3.bf16.msra.mxu0 %v205_v16 }
  0x28   :  { %207 = vmatprep.subr.bf16.mxu0 %v274_v0 }
  0x2b   :  { %209 = vmatpush3.bf16.msra.mxu0 %v208_v19 }
  0x2c   :  { %210 = vmatprep.subr.bf16.mxu0 %v274_v0 }
  0x2f   :  { %212 = vmatpush3.bf16.msra.mxu0 %v211_v22 }
  0x30   :  { %213 = vmatprep.subr.bf16.mxu0 %v274_v0 }
  0x33   :  { %215 = vmatpush3.bf16.msra.mxu0 %v214_v25 }
  0x36   :  { %190 = vmatmul.mubr.f32.vlgmr.msra.gmra.mrb[0].mxu0 %v29_v26 }
 0x109   :  { %v119_v28 = vpop.f32.mrb[0].mxu0 }
 0x10a   :  { %v120_v29 = vadd.f32 %v139_v27, %v119_v28  ;;  %v191_v30 = vpop.f32.mrb[1].mxu0 }
 0x10c   :  { %123 = vst [vmem:[#allocation5] sm:$0xff] %v120_v29 }
 0x10d   :  { %256 = shalt.err (!%p253_p12)
}
 0x10e   :  { %s257_s6 = scalar_lea.hbm %s331_s3, 128 }
 0x10f   :  { %p258_p13 = scmp.ne.s32.totalorder %s331_s3, %s257_s6  ;;  %p261_p0 = scmp.lt.u32.totalorder %s257_s6, %s331_s3 }
 0x111   :  { %p263_p1 = pnand %p261_p0, %p258_p13 }
 0x113   :  { %266 = shalt.err (!%p263_p1)
}
 0x114   :  { %133 = dma.vmem_to_hbm [thread:$0]  %s131_s30, 128, %s331_s3, [#allocation4]  }
 0x115   :  { %269 = dma.done.wait [#allocation4], 128  }
 0x116   :  { %270 = vsyncadd [#allocation4], 4294967168 }
 0x117   :  { %137 = vsyncpa [#allocation3], 1 }
 0x118   :  { %138 = vsyncpa [#allocation4], 1 }

</bundles_post_ra>
